<compile_context>
chip_gen: v5e
topology: v5e:2x2
jax: 0.10.0
libtpu: 0.0.40
codegen_flags: <defaults>
</compile_context>

<pallas_src>
import jax
import jax.numpy as jnp
import numpy as np
from jax.experimental import pallas as pl
from jax.experimental.pallas import tpu as pltpu

EPS = 1e-5          # nn.InstanceNorm2d default (affine=False, biased variance)
NEG_SLOPE = 0.2     # nn.LeakyReLU(0.2)


def _make_layer_kernel(has_proj: bool):
    """Fused conv(3x3, s2) + bias + InstanceNorm + LeakyReLU [+ fused 1x1 conv]."""

    def kernel(*refs):
        if has_proj:
            p_ref, w_ref, b_ref, w5_ref, b5_ref, o_ref = refs
        else:
            p_ref, w_ref, b_ref, o_ref = refs

        # conv as matmul, lane-dense in HW: (Cout, 9Cin) @ (9Cin, HW) -> f32 acc
        y = jnp.dot(w_ref[...], p_ref[0], preferred_element_type=jnp.float32)
        y = y + b_ref[...]                                    # (Cout, 1) bcast

        # InstanceNorm2d over the spatial (lane) axis, f32 arithmetic.
        inv_hw = 1.0 / y.shape[-1]
        mean = jnp.sum(y, axis=-1, keepdims=True) * inv_hw
        yc = y - mean
        var = jnp.sum(yc * yc, axis=-1, keepdims=True) * inv_hw
        y = yc * jax.lax.rsqrt(var + EPS)

        # LeakyReLU(0.2)
        y = jnp.where(y >= 0.0, y, NEG_SLOPE * y)

        if has_proj:
            # fused conv5 (1x1): (1, Cout) @ (Cout, HW) + b5, kept in f32
            z = jnp.dot(w5_ref[...], y, preferred_element_type=jnp.float32)
            o_ref[0] = (z + b5_ref[...]).astype(o_ref.dtype)
        else:
            o_ref[0] = y.astype(o_ref.dtype)

    return kernel


def _fused_layer(patches, w_mat, b, w5=None, b5=None):
    """patches: (N, 9Cin, HW) bf16; w_mat: (Cout, 9Cin) bf16; b: (Cout,) f32."""
    N, KC, HW = patches.shape
    Cout = w_mat.shape[0]
    has_proj = w5 is not None
    out_c = 1 if has_proj else Cout

    in_specs = [
        pl.BlockSpec((1, KC, HW), lambda n: (n, 0, 0)),       # patches
        pl.BlockSpec((Cout, KC), lambda n: (0, 0)),           # conv weight
        pl.BlockSpec((Cout, 1), lambda n: (0, 0)),            # conv bias
    ]
    args = [patches, w_mat, b.reshape(Cout, 1).astype(jnp.float32)]
    if has_proj:
        in_specs += [pl.BlockSpec((1, Cout), lambda n: (0, 0)),
                     pl.BlockSpec((1, 1), lambda n: (0, 0))]
        args += [w5.reshape(1, Cout).astype(jnp.float32),
                 b5.reshape(1, 1).astype(jnp.float32)]

    return pl.pallas_call(
        _make_layer_kernel(has_proj),
        out_shape=jax.ShapeDtypeStruct((N, out_c, HW), jnp.float32),
        grid_spec=pltpu.PrefetchScalarGridSpec(
            num_scalar_prefetch=0,
            grid=(N,),
            in_specs=in_specs,
            out_specs=pl.BlockSpec((1, out_c, HW), lambda n: (n, 0, 0)),
        ),
        compiler_params=pltpu.CompilerParams(
            dimension_semantics=("parallel",),
            vmem_limit_bytes=32 * 1024 * 1024),
    )(*args)


def _patches_s2(x):
    """x: (N, C, H, W) f32 -> 3x3 / stride-2 / zero-pad-1 patches (N, 9C, Ho*Wo) bf16."""
    N, C, H, W = x.shape
    Ho, Wo = (H + 1) // 2, (W + 1) // 2
    xp = jnp.pad(x, ((0, 0), (0, 0), (1, 1), (1, 1)))          # zero padding
    taps = []
    for ky in range(3):
        for kx in range(3):
            taps.append(xp[:, :, ky:ky + 2 * Ho - 1:2, kx:kx + 2 * Wo - 1:2])
    p = jnp.stack(taps, axis=2)                                # (N, C, 9, Ho, Wo)
    p = p.reshape(N, C * 9, Ho * Wo).astype(jnp.bfloat16)      # matches OIHW reshape
    return p, (Ho, Wo)


def discriminator_frame(x, params):
    """x: (N, 3, H, W) f32 NCHW -> (N, 1, H/16, W/16) f32 NCHW."""
    N = x.shape[0]
    h = x
    for wk, bk in (("w1", "b1"), ("w2", "b2"), ("w3", "b3")):
        p, (Ho, Wo) = _patches_s2(h)
        cout = params[wk].shape[0]
        w_mat = params[wk].reshape(cout, -1).astype(jnp.bfloat16)
        h = _fused_layer(p, w_mat, params[bk]).reshape(N, cout, Ho, Wo)

    # conv4 + IN + LeakyReLU + conv5 (1x1) fused in a single kernel
    p, (Ho, Wo) = _patches_s2(h)
    cout = params["w4"].shape[0]
    w_mat = params["w4"].reshape(cout, -1).astype(jnp.bfloat16)
    out = _fused_layer(p, w_mat, params["b4"], w5=params["w5"], b5=params["b5"])
    return out.reshape(N, 1, Ho, Wo)


def reference(x, params):
    """Plain-JAX reference matching the PyTorch forward (bf16 conv operands,
    f32 accumulation — same numerics contract as the Pallas kernel)."""

    def layer(inp, w, b):
        y = jax.lax.conv_general_dilated(
            inp.astype(jnp.bfloat16), w.astype(jnp.bfloat16),
            window_strides=(2, 2), padding=((1, 1), (1, 1)),
            dimension_numbers=("NCHW", "OIHW", "NCHW"),
            preferred_element_type=jnp.float32)
        y = y + b.reshape(1, -1, 1, 1)
        mean = jnp.mean(y, axis=(2, 3), keepdims=True)
        var = jnp.mean((y - mean) ** 2, axis=(2, 3), keepdims=True)
        y = (y - mean) * jax.lax.rsqrt(var + EPS)
        return jnp.where(y >= 0.0, y, NEG_SLOPE * y)

    h = layer(x, params["w1"], params["b1"])
    h = layer(h, params["w2"], params["b2"])
    h = layer(h, params["w3"], params["b3"])
    h = layer(h, params["w4"], params["b4"])
    out = jax.lax.conv_general_dilated(
        h, params["w5"], window_strides=(1, 1), padding="VALID",
        dimension_numbers=("NCHW", "OIHW", "NCHW"))
    return out + params["b5"].reshape(1, -1, 1, 1)


if __name__ == "__main__":
    N, H, W = 2, 32, 32
    key = jax.random.PRNGKey(0)
    keys = jax.random.split(key, 11)

    def winit(k, cout, cin, kh, kw):
        fan_in = cin * kh * kw
        return jax.random.normal(k, (cout, cin, kh, kw),
                                 dtype=jnp.float32) / np.sqrt(fan_in)

    params = dict(
        w1=winit(keys[0], 16, 3, 3, 3),
        b1=0.1 * jax.random.normal(keys[1], (16,), dtype=jnp.float32),
        w2=winit(keys[2], 32, 16, 3, 3),
        b2=0.1 * jax.random.normal(keys[3], (32,), dtype=jnp.float32),
        w3=winit(keys[4], 64, 32, 3, 3),
        b3=0.1 * jax.random.normal(keys[5], (64,), dtype=jnp.float32),
        w4=winit(keys[6], 128, 64, 3, 3),
        b4=0.1 * jax.random.normal(keys[7], (128,), dtype=jnp.float32),
        w5=winit(keys[8], 1, 128, 1, 1),
        b5=0.1 * jax.random.normal(keys[9], (1,), dtype=jnp.float32),
    )
    x = jax.random.normal(keys[10], (N, 3, H, W), dtype=jnp.float32)

    out = discriminator_frame(x, params)
    jax.block_until_ready(out)

    ref = reference(x, params)
    # bf16 conv operands in both paths; small residual divergence comes only
    # from accumulation-order / rounding differences across the 4 norm layers.
    np.testing.assert_allclose(np.asarray(out), np.asarray(ref),
                               rtol=2e-2, atol=2e-2)
    print("KERNEL_OK")
</pallas_src>

<mosaic_0001>
module attributes {stable_mosaic.version = 11 : i64} {
  func.func @kernel(%arg0: i32, %arg1: memref<1x27x256xbf16, #tpu.memory_space<vmem>>, %arg2: memref<16x27xbf16, #tpu.memory_space<vmem>>, %arg3: memref<16x1xf32, #tpu.memory_space<vmem>>, %arg4: memref<1x16x256xf32, #tpu.memory_space<vmem>>) attributes {dimension_semantics = [#tpu.dimension_semantics<parallel>], iteration_bounds = array<i64: 2>, scalar_prefetch = 0 : i64, scratch_operands = 0 : i64, tpu.core_type = #tpu.core_type<tc>, window_params = [{transform_indices = @transform_0, window_bounds = array<i64: 1, 27, 256>}, {pipeline_mode = #tpu.pipeline_mode<synchronous>, transform_indices = @transform_1, window_bounds = array<i64: 16, 27>}, {pipeline_mode = #tpu.pipeline_mode<synchronous>, transform_indices = @transform_2, window_bounds = array<i64: 16, 1>}, {transform_indices = @transform_3, window_bounds = array<i64: 1, 16, 256>}]} {
    %c0 = arith.constant 0 : index
    %c0_0 = arith.constant 0 : index
    %0 = vector.load %arg2[%c0, %c0_0] : memref<16x27xbf16, #tpu.memory_space<vmem>>, vector<16x27xbf16>
    %c0_1 = arith.constant 0 : index
    %c0_2 = arith.constant 0 : index
    %c0_3 = arith.constant 0 : index
    %1 = vector.load %arg1[%c0_1, %c0_2, %c0_3] : memref<1x27x256xbf16, #tpu.memory_space<vmem>>, vector<1x27x256xbf16>
    %2 = vector.shape_cast %1 : vector<1x27x256xbf16> to vector<27x256xbf16>
    %cst = arith.constant dense<0.000000e+00> : vector<16x256xf32>
    %3 = tpu.matmul %0, %2, %cst {dimension_numbers = #tpu.dot_dimension_numbers<[1], [0], [0], [1], [0, 0, 1, 1], [], []>} : vector<16x27xbf16>, vector<27x256xbf16>, vector<16x256xf32> -> vector<16x256xf32>
    %c0_4 = arith.constant 0 : index
    %c0_5 = arith.constant 0 : index
    %4 = vector.load %arg3[%c0_4, %c0_5] : memref<16x1xf32, #tpu.memory_space<vmem>>, vector<16x1xf32>
    %5 = vector.broadcast %4 : vector<16x1xf32> to vector<16x256xf32>
    %6 = arith.addf %3, %5 : vector<16x256xf32>
    %cst_6 = arith.constant dense<0.000000e+00> : vector<16xf32>
    %7 = vector.multi_reduction <add>, %6, %cst_6 [1] : vector<16x256xf32> to vector<16xf32>
    %8 = vector.shape_cast %7 : vector<16xf32> to vector<16x1xf32>
    %cst_7 = arith.constant 3.906250e-03 : f32
    %9 = vector.broadcast %cst_7 : f32 to vector<16x1xf32>
    %10 = arith.mulf %8, %9 : vector<16x1xf32>
    %11 = vector.broadcast %10 : vector<16x1xf32> to vector<16x256xf32>
    %12 = arith.subf %6, %11 : vector<16x256xf32>
    %13 = arith.mulf %12, %12 : vector<16x256xf32>
    %cst_8 = arith.constant dense<0.000000e+00> : vector<16xf32>
    %14 = vector.multi_reduction <add>, %13, %cst_8 [1] : vector<16x256xf32> to vector<16xf32>
    %15 = vector.shape_cast %14 : vector<16xf32> to vector<16x1xf32>
    %cst_9 = arith.constant 3.906250e-03 : f32
    %16 = vector.broadcast %cst_9 : f32 to vector<16x1xf32>
    %17 = arith.mulf %15, %16 : vector<16x1xf32>
    %cst_10 = arith.constant 9.99999974E-6 : f32
    %18 = vector.broadcast %cst_10 : f32 to vector<16x1xf32>
    %19 = arith.addf %17, %18 : vector<16x1xf32>
    %20 = math.rsqrt %19 : vector<16x1xf32>
    %21 = vector.broadcast %20 : vector<16x1xf32> to vector<16x256xf32>
    %22 = arith.mulf %12, %21 : vector<16x256xf32>
    %cst_11 = arith.constant 0.000000e+00 : f32
    %23 = vector.broadcast %cst_11 : f32 to vector<16x256xf32>
    %24 = arith.cmpf oge, %22, %23 : vector<16x256xf32>
    %cst_12 = arith.constant 2.000000e-01 : f32
    %25 = vector.broadcast %cst_12 : f32 to vector<16x256xf32>
    %26 = arith.mulf %25, %22 : vector<16x256xf32>
    %27 = arith.select %24, %22, %26 : vector<16x256xi1>, vector<16x256xf32>
    %c0_13 = arith.constant 0 : index
    %c0_14 = arith.constant 0 : index
    %c0_15 = arith.constant 0 : index
    %28 = vector.load %arg4[%c0_13, %c0_14, %c0_15] : memref<1x16x256xf32, #tpu.memory_space<vmem>>, vector<1x16x256xf32>
    %29 = vector.shape_cast %28 : vector<1x16x256xf32> to vector<16x256xf32>
    %30 = vector.shape_cast %27 : vector<16x256xf32> to vector<1x16x256xf32>
    tpu.vector_store %arg4[%c0_13, %c0_14, %c0_15], %30 {strides = array<i32>} : memref<1x16x256xf32, #tpu.memory_space<vmem>>, vector<1x16x256xf32>,
    return
  }
  func.func @transform_0(%arg0: i32) -> (i32, i32, i32) {
    %c0_i32 = arith.constant 0 : i32
    %c0_i32_0 = arith.constant 0 : i32
    %c0_i32_1 = arith.constant 0 : i32
    return %arg0, %c0_i32, %c0_i32_0 : i32, i32, i32
  }
  func.func @transform_1(%arg0: i32) -> (i32, i32) {
    %c0_i32 = arith.constant 0 : i32
    %c0_i32_0 = arith.constant 0 : i32
    %c0_i32_1 = arith.constant 0 : i32
    return %c0_i32, %c0_i32_0 : i32, i32
  }
  func.func @transform_2(%arg0: i32) -> (i32, i32) {
    %c0_i32 = arith.constant 0 : i32
    %c0_i32_0 = arith.constant 0 : i32
    %c0_i32_1 = arith.constant 0 : i32
    return %c0_i32, %c0_i32_0 : i32, i32
  }
  func.func @transform_3(%arg0: i32) -> (i32, i32, i32) {
    %c0_i32 = arith.constant 0 : i32
    %c0_i32_0 = arith.constant 0 : i32
    %c0_i32_1 = arith.constant 0 : i32
    return %arg0, %c0_i32, %c0_i32_0 : i32, i32, i32
  }
}

</mosaic_0001>

<bundles_post_ra>
// kernel: tpu_custom_call.1
= control target key start
LH: loop header
LB: loop body
LE: loop exit
PB: predicated region body
PF: predicated region fallthrough
CT: control target
= control target key end

     0   :  { %8 = vsyncpa [#allocation3], 0  ;;  %s672_s0 = inlined_call_operand.vmem [shape: bf16[2,27,256], index: 0, kind: input, shape index: {}]   ;;  %s673_s1 = inlined_call_operand.vmem [shape: bf16[16,27], index: 1, kind: input, shape index: {}]   ;;  %s674_s2 = inlined_call_operand.vmem [shape: f32[16,1], index: 2, kind: input, shape index: {}]   ;;  %s675_s3 = inlined_call_operand.hbm [shape: f32[2,16,256], index: 3, kind: output, shape index: {}]  }
   0x1   :  { %10 = vsyncpa [#allocation3 + $0x1], 0  ;;  %s574_s12 = smov 0   ;;  %s576_s13 = smov 0  }
   0x2   :  { %s578_s14 = smov 0   ;;  %s580_s15 = smov 0  }
   0x3 LB: > { %s595_s16 = sadd.s32 4294967295, %s548_s15   ;;  %s397_s17 = sadd.s32 4294967294, %s548_s15   ;;  %s548_s15 = sphi %s580_s15, %s681_s15   ;;  %s544_s14 = sphi %s578_s14, %s680_s14   ;;  %s540_s13 = sphi %s576_s13, %s679_s13   ;;  %s536_s12 = sphi %s574_s12, %s678_s12  }
   0x4   : > { %s599_s18 = sadd.s32 1, %s548_s15   ;;  %s91_s19 = sadd.s32 1, %s544_s14 }
   0x5   : > { %s88_s20 = ssub.s32 %s548_s15, %s599_s18  ;;  %p101_p0 = scmp.ne.s32.totalorder %s544_s14, %s540_s13 }
   0x6   : > { %p89_p1 = scmp.eq.s32.totalorder %s88_s20, 0  ;;  %p102_p2 = scmp.eq.s32.totalorder %s595_s16, 1 }
   0x7   : > { %p107_p3 = scmp.ne.s32.totalorder %s540_s13, %s536_s12  ;;  %p108_p4 = scmp.eq.s32.totalorder %s397_s17, 1 }
   0x8   : > { %s610_s21 = scalar_select %p89_p1, %s544_s14, %s91_s19  }
   0x9   : > { %p612_p5 = por %p102_p2, %p101_p0  ;;  %p616_p6 = por %p108_p4, %p107_p3 }
   0xa   : > { %p400_p7 = scmp.ge.s32.totalorder %s548_s15, 1  ;;  %p140_p8 = scmp.lt.s32.totalorder %s548_s15, 3 }
   0xc   : > { %p141_p9 = pnand %p400_p7, %p140_p8 }
   0xd   : > { %p164_p10 = scmp.lt.s32.totalorder (!%p141_p9), %s595_s16, 1  ;;  %s161_s8 = sand.u32 (!%p141_p9), 1, %s540_s13  }
   0xe   : > { %144 = sbr.rel (%p141_p9) target bundleno = 446 (0x1be), region = 32  ;;  %s401_s9 = sshll.u32 (!%p141_p9), %s161_s8, 5 }
   0xf   : > { %s437_s10 = sshll.u32 (!%p141_p9), %s595_s16, 5  ;;  %s163_s11 = scalar_lea.vmem (!%p141_p9), [#allocation2], %s401_s9 }
  0x10   : > { %s331_s20 = scalar_lea.hbm (!%p141_p9), %s675_s3, %s437_s10  ;;  %s320_s25 = scalar_lea.sflag (!%p141_p9), [#allocation3], %s161_s8 }
  0x11   : > { %s334_s24 = sshll.u32 (!%p141_p9), %s331_s20, 4  ;;  %s335_s24 = int_to_ptr.hbm [resolvable:$true] %s334_s24 }
  0x13   : > { %vm215_vm0 = vcmask 1044480   ;;  %v176_v0 = vld [vmem:[%s674_s2] sm:$0xff]  ;;  %s165_s26 = scalar_select %p164_p10, %s595_s16, 1  ;;  %vm216_vm1 = vcmask 1045504   ;;  %v550_v1 = vmov 65535   ;;  %v551_v3 = vmov 0  }
  0x14   : > { %v217_v2 = vsel %vm215_vm0, 4294967295, %v550_v1  ;;  %481 = vset.pattern.permute.xlu0 %v551_v3  ;;  %v177_v13 = vld [vmem:[%s674_s2 + $0x8] sm:$0xff]  ;;  %v432_v20 = vld [vmem:[%s673_s1] sm:$0xff]  ;;  %vm211_vm2 = vcmask 220160   ;;  %s332_s16 = sshll.u32 %s163_s11, 4  ;;  %s333_s16 = int_to_ptr.vmem [resolvable:$true] %s332_s16 }
  0x15   : > { %180 = vperm.xlu0 %481, %v176_v0   ;;  %s431_s27 = sshll.u32 %s165_s26, 5  ;;  %v218_v4 = vsel %vm216_vm1, %v217_v2, 0  ;;  %s500_s26 = sshra.s32 %s335_s24, 4  ;;  %s501_s26 = int_to_ptr.hbm [resolvable:$true] %s500_s26 }
  0x16   : > { %s168_s30 = scalar_lea.vmem %s672_s0, %s431_s27  ;;  %s502_s27 = scalar_lea.hbm %s501_s26, 32 }
  0x17   : > { %v418_v5 = vld [vmem:[%s168_s30 + $0x10] sm:$0xf]  ;;  %v436_v6 = vld [vmem:[%s168_s30 + $0x14] sm:$0x30]  ;;  %v435_v7 = vld [vmem:[%s168_s30 + $0x14] sm:$0xf]  ;;  %p503_p11 = scmp.ne.s32.totalorder %s501_s26, %s502_s27  ;;  %p507_p0 = scmp.lt.s32.totalorder %s501_s26, %s675_s3 }
  0x18   : > { %v419_v8 = vor.u32 %v436_v6, %v418_v5  ;;  %v420_v9 = vld [vmem:[%s168_s30 + $0x18] sm:$0x30]  ;;  %v410_v11 = vld [vmem:[%s168_s30] sm:$0xf]  ;;  %v434_v12 = vld [vmem:[%s168_s30 + $0x4] sm:$0xf0] }
  0x19   : > { %v423_v10 = vor.u32 %v435_v7, %v420_v9  ;;  %v433_v15 = vld [vmem:[%s168_s30 + $0x4] sm:$0xf]  ;;  %v412_v16 = vld [vmem:[%s168_s30 + $0x8] sm:$0xf0]  ;;  %v411_v18 = vor.u32 %v434_v12, %v410_v11  ;;  %p504_p12 = pnand %p503_p11, %p612_p5  ;;  %s506_s30 = scalar_lea.hbm %s675_s3, 64 }
  0x1a   : > { %v220_v14 = vand.u32 %v419_v8, %v218_v4  ;;  %v415_v19 = vor.u32 %v433_v15, %v412_v16  ;;  %p508_p1 = scmp.lt.s32.totalorder %s506_s30, %s502_s27 }
  0x1b   : > { %v223_v17 = vand.u32 %v423_v10, %v218_v4  ;;  %p505_p13 = pneg %p504_p12 }
  0x1c   : > { %231 = vmatpush.bf16.msra.mxu0 %v220_v14  ;;  %p509_p2 = por %p508_p1, %p507_p0 }
  0x1d   : > { %185 = vperm.xlu0 %481, %v177_v13   ;;  %245 = vmatpush.bf16.msra.mxu1 %v223_v17 }
  0x1e   : > { %p510_p3 = pnand %p509_p2, %p505_p13 }
  0x20   : > { %232 = vmatpush.bf16.msra.mxu0 %v411_v18 }
  0x21   : > { %246 = vmatpush.bf16.msra.mxu1 %v415_v19 }
  0x23   : > { %424 = vmatmul.msk.bf16.vlgmr.msra.gmra.mxu0 %vm211_vm2, %v432_v20 }
  0x24   : > { %425 = vmatmul.msk.bf16.vlgmr.msra.gmra.mxu1 %vm211_vm2, %v432_v20 }
  0x87   : > { %v181_v21 = vpop.permute.xlu0 %180 }
  0x8f   : > { %v186_v27 = vpop.permute.xlu0 %185 }
  0xa0   : > { %v234_v22 = vpop.f32.mrf.mxu0 }
  0xa1   : > { %v235_v23 = vadd.f32 %v234_v22, %v181_v21  ;;  %v248_v24 = vpop.f32.mrf.mxu1 }
  0xa2   : > { %v249_v25 = vadd.f32 %v248_v24, %v181_v21 }
  0xa4   : > { %v253_v26 = vadd.f32 %v249_v25, %v235_v23 }
  0xa6   : > { %254 = vadd.xlane.f32.xlu1 %v253_v26 }
  0xa8   : > { %v236_v28 = vpop.f32.mrf.mxu0 }
  0xa9   : > { %v237_v29 = vadd.f32 %v236_v28, %v186_v27  ;;  %v250_v30 = vpop.f32.mrf.mxu1 }
  0xaa   : > { %v251_v31 = vadd.f32 %v250_v30, %v186_v27 }
  0xac   : > { %v256_v32 = vadd.f32 %v251_v31, %v237_v29 }
  0xae   : > { %257 = vadd.xlane.f32.xlu1 %v256_v32 }
 0x119   : > { %v255_v33 = vpop.xlane.xlu1 %254 }
 0x11a   : > { %v259_v34 = vmul.f32 0.00390625, %v255_v33 }
 0x11c   : > { %v261_v35 = vsub.f32 %v235_v23, %v259_v34  ;;  %v262_v36 = vsub.f32 %v249_v25, %v259_v34 }
 0x11e   : > { %v265_v37 = vmul.f32 %v261_v35, %v261_v35  ;;  %v266_v38 = vmul.f32 %v262_v36, %v262_v36 }
 0x120   : > { %v269_v39 = vadd.f32 %v266_v38, %v265_v37 }
 0x121   : > { %v258_v40 = vpop.xlane.xlu1 %257 }
 0x122   : > { %v260_v41 = vmul.f32 0.00390625, %v258_v40  ;;  %270 = vadd.xlane.f32.xlu2 %v269_v39 }
 0x124   : > { %v263_v42 = vsub.f32 %v237_v29, %v260_v41  ;;  %v264_v43 = vsub.f32 %v251_v31, %v260_v41 }
 0x126   : > { %v267_v44 = vmul.f32 %v263_v42, %v263_v42  ;;  %v268_v45 = vmul.f32 %v264_v43, %v264_v43 }
 0x128   : > { %v272_v46 = vadd.f32 %v268_v45, %v267_v44 }
 0x12a   : > { %273 = vadd.xlane.f32.xlu2 %v272_v46 }
 0x195   : > { %v271_v47 = vpop.xlane.xlu2 %270 }
 0x196   : > { %v275_v48 = vmul.f32 0.00390625, %v271_v47 }
 0x198   : > { %v277_v49 = vadd.f32 1e-05, %v275_v48 }
 0x19a   : > { %482 = vrsqrt.f32 %v277_v49  ;;  %vm285_vm4 = vweird.f32 %v277_v49 }
 0x19d   : > { %v274_v50 = vpop.xlane.xlu2 %273 }
 0x19e   : > { %v276_v51 = vmul.f32 0.00390625, %v274_v50 }
 0x1a0   : > { %v483_v52 = vpop.eup %482  ;;  %v278_v53 = vadd.f32 1e-05, %v276_v51 }
 0x1a1   : > { %v280_v54 = vmul.f32 %v483_v52, %v277_v49  ;;  %vm286_vm3 = vweird.f32 %v483_v52 }
 0x1a2   : > { %484 = vrsqrt.f32 %v278_v53  ;;  %vm287_vm5 = vmor %vm285_vm4, %vm286_vm3  ;;  %vm295_vm9 = vweird.f32 %v278_v53 }
 0x1a3   : > { %v281_v55 = vmul.f32 %v483_v52, %v280_v54 }
 0x1a5   : > { %v282_v56 = vmul.f32 0.5, %v281_v55 }
 0x1a7   : > { %v283_v57 = vsub.f32 1.5, %v282_v56 }
 0x1a8   : > { %v485_v58 = vpop.eup %484 }
 0x1a9   : > { %v284_v59 = vmul.f32 %v483_v52, %v283_v57  ;;  %v290_v60 = vmul.f32 %v485_v58, %v278_v53  ;;  %vm296_vm8 = vweird.f32 %v485_v58 }
 0x1aa   : > { %vm297_vm10 = vmor %vm295_vm9, %vm296_vm8 }
 0x1ab   : > { %v288_v61 = vsel %vm287_vm5, %v483_v52, %v284_v59  ;;  %v291_v62 = vmul.f32 %v485_v58, %v290_v60 }
 0x1ac   : > { %v299_v63 = vmul.f32 %v288_v61, %v261_v35  ;;  %v300_v0 = vmul.f32 %v288_v61, %v262_v36 }
 0x1ad   : > { %v292_v1 = vmul.f32 0.5, %v291_v62 }
 0x1ae   : > { %vm303_vm6 = vcmp.ge.f32.partialorder %v299_v63, 0.0  ;;  %vm304_vm7 = vcmp.ge.f32.partialorder %v300_v0, 0.0  ;;  %v307_v2 = vmul.f32 0.2, %v299_v63  ;;  %v308_v3 = vmul.f32 0.2, %v300_v0 }
 0x1af   : > { %v293_v4 = vsub.f32 1.5, %v292_v1 }
 0x1b0   : > { %v311_v5 = vsel %vm303_vm6, %v299_v63, %v307_v2  ;;  %v312_v6 = vsel %vm304_vm7, %v300_v0, %v308_v3 }
 0x1b1   : > { %315 = vst [vmem:[%s163_s11] sm:$0xff] %v311_v5  ;;  %v294_v7 = vmul.f32 %v485_v58, %v293_v4 }
 0x1b2   : > { %316 = vst [vmem:[%s163_s11 + $0x8] sm:$0xff] %v312_v6 }
 0x1b3   : > { %v298_v8 = vsel %vm297_vm10, %v485_v58, %v294_v7 }
 0x1b4   : > { %v301_v9 = vmul.f32 %v298_v8, %v263_v42  ;;  %v302_v10 = vmul.f32 %v298_v8, %v264_v43 }
 0x1b6   : > { %vm305_vm11 = vcmp.ge.f32.partialorder %v301_v9, 0.0  ;;  %vm306_vm12 = vcmp.ge.f32.partialorder %v302_v10, 0.0  ;;  %v309_v11 = vmul.f32 0.2, %v301_v9  ;;  %v310_v12 = vmul.f32 0.2, %v302_v10 }
 0x1b8   : > { %v313_v13 = vsel %vm305_vm11, %v301_v9, %v309_v11  ;;  %v314_v14 = vsel %vm306_vm12, %v302_v10, %v310_v12 }
 0x1b9   : > { %317 = vst [vmem:[%s163_s11 + $0x10] sm:$0xff] %v313_v13 }
 0x1ba   : > { %318 = vst [vmem:[%s163_s11 + $0x18] sm:$0xff] %v314_v14 }
 0x1bb   : > { %513 = shalt.err (!%p510_p3)
}
 0x1bc   : > { %s552_s6 = smov 256   ;;  %s553_s7 = smov 16  }
 0x1bd   : > { %438 = dma.vmem_to_hbm [thread:$0]  (%p612_p5), %s333_s16, 512, %s335_s24, %s320_s25, %s552_s6, %s552_s6, %s553_s7  }
 0x1be PF: > { %p444_p4 = scmp.ge.s32.totalorder %s548_s15, 2  ;;  %s349_s8 = sand.u32 1, %s536_s12  }
 0x1bf   : > { %s350_s9 = scalar_lea.sflag [#allocation3], %s349_s8 }
 0x1c0   : > { %p441_p7 = pnand %p444_p4, %p616_p6 }
 0x1c2   : > { %p442_p8 = pneg %p441_p7 }
 0x1c4   : > { %531 = dma.done.wait (%p442_p8), %s350_s9, 512  }
 0x1c5   : > { %533 = vsyncadd (%p442_p8), %s350_s9, 4294966784  ;;  %p13_p9 = scmp.ge.s32.totalorder %s599_s18, 4   ;;  %s678_s12 = smov %s540_s13 }
 0x1c6   : > { %s679_s13 = smov %s544_s14  ;;  %s680_s14 = smov %s610_s21 }
 0x1c7   : > { %s681_s15 = smov %s599_s18  ;;  %15 = sbr.rel (!%p13_p9) target bundleno = 3 (0x3), region = 67 }
 0x1cc   :  { %356 = vsyncpa [#allocation3], 1 }
 0x1cd   :  { %358 = vsyncpa [#allocation3 + $0x1], 1 }

</bundles_post_ra>
